<compile_context>
chip_gen: v7x
topology: tpu7x:2x2x1
jax: 0.10.0
libtpu: 0.0.40
codegen_flags: <defaults>
</compile_context>

<pallas_src>
import functools

import jax
import jax.numpy as jnp
from jax.experimental import pallas as pl
from jax.experimental.pallas import tpu as pltpu

EPS = 1e-5
_LANE = 128


# --------------------------------------------------------------------------
# Generation-aware VMEM / block budgets
# --------------------------------------------------------------------------
@functools.lru_cache(maxsize=1)
def _chip_budgets():
    vmem_bytes = 64 * 1024 * 1024  # conservative fallback (v7x-shaped, safe everywhere)
    try:
        vmem_bytes = int(pltpu.get_tpu_info().vmem_capacity_bytes)
    except Exception:
        pass
    if vmem_bytes >= 96 * 1024 * 1024:
        # v5e / v6e: 128 MiB VMEM, single TensorCore per chip.
        return {"vmem_limit": 96 * 1024 * 1024,
                "max_block": 14 * 1024 * 1024,
                "multi_tc": False}
    # v7x-shaped: 64 MiB VMEM per TC, 2 TCs per chip.
    return {"vmem_limit": 56 * 1024 * 1024,
            "max_block": 8 * 1024 * 1024,
            "multi_tc": True}


# --------------------------------------------------------------------------
# Path 1: whole sample(s) fit comfortably in VMEM -> one fused 2-HBM-pass kernel
# --------------------------------------------------------------------------
def _gln_fused_kernel(x_ref, w_ref, b_ref, o_ref, *, n, eps):
    # x_ref: (bb, C, T) block; w_ref/b_ref: (C, 1).
    xf = x_ref[...].astype(jnp.float32)

    # Hierarchical stats: lane reduce (T) then sublane reduce (C), f32 accum.
    row_s = jnp.sum(xf, axis=2, keepdims=True)           # (bb, C, 1)
    row_q = jnp.sum(xf * xf, axis=2, keepdims=True)      # (bb, C, 1)
    s = jnp.sum(row_s, axis=1, keepdims=True)            # (bb, 1, 1)
    q = jnp.sum(row_q, axis=1, keepdims=True)            # (bb, 1, 1)

    mean = s * (1.0 / n)
    var = jnp.maximum((q - s * mean) * (1.0 / (n - 1)), 0.0)   # unbiased, clamped
    inv_std = jax.lax.rsqrt(var + eps)                   # EUP

    w = w_ref[...].astype(jnp.float32)                   # (C, 1)
    b = b_ref[...].astype(jnp.float32)
    scale = inv_std * w                                   # (bb, C, 1)
    shift = b - mean * scale                              # (bb, C, 1)

    # Re-read x_ref so sub-32-bit inputs don't keep a block-sized f32 upcast
    # live across both stats and normalize; normalize is a single FMA-able op.
    o_ref[...] = (x_ref[...].astype(jnp.float32) * scale + shift).astype(o_ref.dtype)


def _gln_small(x, w, b, n, eps, max_block_bytes, vmem_limit, multi_tc):
    B, C, T = x.shape
    per_f32 = C * T * 4                       # f32-equivalent bytes (covers upcast temps)
    bb = max(1, min(B, max_block_bytes // per_f32))
    if multi_tc and B >= 2:
        # Keep >= 2 grid steps so both TensorCores (v7x) get work.
        bb = min(bb, max(1, (B + 1) // 2))
    grid = (pl.cdiv(B, bb),)                  # partial last batch block is fine:
                                              # OOB reads give garbage per-sample stats,
                                              # OOB writes are dropped by Pallas.
    return pl.pallas_call(
        functools.partial(_gln_fused_kernel, n=n, eps=eps),
        out_shape=jax.ShapeDtypeStruct((B, C, T), x.dtype),
        grid_spec=pltpu.PrefetchScalarGridSpec(
            num_scalar_prefetch=0,
            grid=grid,
            in_specs=[
                pl.BlockSpec((bb, C, T), lambda i: (i, 0, 0)),
                pl.BlockSpec((C, 1), lambda i: (0, 0)),
                pl.BlockSpec((C, 1), lambda i: (0, 0)),
            ],
            out_specs=pl.BlockSpec((bb, C, T), lambda i: (i, 0, 0)),
        ),
        compiler_params=pltpu.CompilerParams(
            dimension_semantics=("parallel",),
            vmem_limit_bytes=vmem_limit,
        ),
        cost_estimate=pl.CostEstimate(
            flops=7 * B * C * T,
            transcendentals=B,
            bytes_accessed=2 * B * C * T * x.dtype.itemsize,
        ),
    )(x, w, b)


# --------------------------------------------------------------------------
# Path 2: sample too large for one VMEM block -> T-tiled stats + normalize
# --------------------------------------------------------------------------
def _gln_stats_kernel(x_ref, w_ref, b_ref, scale_ref, shift_ref,
                      sum_acc, ssq_acc, *, n, eps, t_true, tt):
    # grid = (B, nT); accumulate lane-wide per-channel partials across T tiles.
    ti = pl.program_id(1)

    @pl.when(ti == 0)
    def _():
        sum_acc[...] = jnp.zeros_like(sum_acc)
        ssq_acc[...] = jnp.zeros_like(ssq_acc)

    x = x_ref[...].astype(jnp.float32)                    # (1, C, tt)
    if t_true % tt != 0:
        # Ragged tail handled in-kernel (no wrapper padding pass over x).
        col = jax.lax.broadcasted_iota(jnp.int32, (1, 1, tt), 2) + ti * tt
        x = jnp.where(col < t_true, x, 0.0)

    # Lane-parallel fold tt -> 128 lanes with pure VPU adds (tt = 128 * 2**k,
    # all slice offsets are multiples of 128 so these are vreg selections).
    # The cross-lane XLU reduction is deferred to the last-tile epilogue.
    xs, xq = x, x * x
    width = tt
    while width > _LANE:
        half = width // 2
        xs = xs[:, :, :half] + xs[:, :, half:width]
        xq = xq[:, :, :half] + xq[:, :, half:width]
        width = half
    sum_acc[...] += xs                                    # (1, C, 128) lane-dense RMW
    ssq_acc[...] += xq

    @pl.when(ti == pl.num_programs(1) - 1)
    def _():
        s = jnp.sum(sum_acc[...], axis=(1, 2), keepdims=True)   # (1, 1, 1)
        q = jnp.sum(ssq_acc[...], axis=(1, 2), keepdims=True)
        mean = s * (1.0 / n)
        var = jnp.maximum((q - s * mean) * (1.0 / (n - 1)), 0.0)
        inv_std = jax.lax.rsqrt(var + eps)
        w = w_ref[...].astype(jnp.float32)                       # (C, 1)
        b = b_ref[...].astype(jnp.float32)
        scale = inv_std * w                                      # (1, C, 1)
        shift = b - mean * scale
        scale_ref[...] = scale
        shift_ref[...] = shift


def _gln_norm_kernel(x_ref, scale_ref, shift_ref, o_ref):
    xf = x_ref[...].astype(jnp.float32)                          # (1, C, tt)
    o_ref[...] = (xf * scale_ref[...] + shift_ref[...]).astype(o_ref.dtype)


def _gln_tiled(x, w, b, n, eps, max_block_bytes, vmem_limit):
    B, C, T = x.shape
    # Lane tile: multiple of 128 with a power-of-two chunk count (for the VPU
    # tree fold), sized from the f32-equivalent per-block byte budget.
    lanes = max(_LANE, max_block_bytes // (C * 4))
    nch = max(1, lanes // _LANE)
    nch = 1 << (nch.bit_length() - 1)           # largest power of two <= nch
    tt = _LANE * nch
    nT = pl.cdiv(T, tt)                          # ragged tail: masked in stats,
                                                 # OOB writes dropped in normalize.

    # TODO(synk): for B == 1 on v7x the stats pass runs on a single TC; a
    # parallel T-split with a tiny cross-core combine would recover ~10-15%.
    scale, shift = pl.pallas_call(
        functools.partial(_gln_stats_kernel, n=n, eps=eps, t_true=T, tt=tt),
        out_shape=(jax.ShapeDtypeStruct((B, C, 1), jnp.float32),
                   jax.ShapeDtypeStruct((B, C, 1), jnp.float32)),
        grid_spec=pltpu.PrefetchScalarGridSpec(
            num_scalar_prefetch=0,
            grid=(B, nT),
            in_specs=[
                pl.BlockSpec((1, C, tt), lambda bi, ti: (bi, 0, ti)),
                pl.BlockSpec((C, 1), lambda bi, ti: (0, 0)),
                pl.BlockSpec((C, 1), lambda bi, ti: (0, 0)),
            ],
            out_specs=(
                pl.BlockSpec((1, C, 1), lambda bi, ti: (bi, 0, 0)),
                pl.BlockSpec((1, C, 1), lambda bi, ti: (bi, 0, 0)),
            ),
            scratch_shapes=[pltpu.VMEM((1, C, _LANE), jnp.float32),
                            pltpu.VMEM((1, C, _LANE), jnp.float32)],
        ),
        compiler_params=pltpu.CompilerParams(
            dimension_semantics=("parallel", "arbitrary"),
            vmem_limit_bytes=vmem_limit,
        ),
        cost_estimate=pl.CostEstimate(
            flops=3 * B * C * T,
            transcendentals=B,
            bytes_accessed=B * C * T * x.dtype.itemsize,
        ),
    )(x, w, b)

    out = pl.pallas_call(
        _gln_norm_kernel,
        out_shape=jax.ShapeDtypeStruct((B, C, T), x.dtype),
        grid_spec=pltpu.PrefetchScalarGridSpec(
            num_scalar_prefetch=0,
            grid=(B, nT),
            in_specs=[
                pl.BlockSpec((1, C, tt), lambda bi, ti: (bi, 0, ti)),
                pl.BlockSpec((1, C, 1), lambda bi, ti: (bi, 0, 0)),
                pl.BlockSpec((1, C, 1), lambda bi, ti: (bi, 0, 0)),
            ],
            out_specs=pl.BlockSpec((1, C, tt), lambda bi, ti: (bi, 0, ti)),
        ),
        compiler_params=pltpu.CompilerParams(
            dimension_semantics=("parallel", "parallel"),
            vmem_limit_bytes=vmem_limit,
        ),
        cost_estimate=pl.CostEstimate(
            flops=2 * B * C * T,
            transcendentals=0,
            bytes_accessed=2 * B * C * T * x.dtype.itemsize,
        ),
    )(x, scale, shift)
    return out


# --------------------------------------------------------------------------
# Public wrapper
# --------------------------------------------------------------------------
def global_layer_norm(x, weight, bias, *, eps=EPS, max_block_bytes=None):
    """x: (B, C, T); weight/bias: (C, 1) (or (C,)). Returns (B, C, T)."""
    B, C, T = x.shape
    if C * T < 2:
        raise ValueError("GlobalLayerNorm needs C*T >= 2 for unbiased variance")
    n = C * T

    budgets = _chip_budgets()
    vmem_limit = budgets["vmem_limit"]
    mb = int(max_block_bytes) if max_block_bytes is not None else budgets["max_block"]

    weight = weight.reshape(C, 1)
    bias = bias.reshape(C, 1)

    per_sample_f32 = C * T * 4
    if per_sample_f32 <= mb:
        return _gln_small(x, weight, bias, n, eps, mb, vmem_limit, budgets["multi_tc"])
    return _gln_tiled(x, weight, bias, n, eps, mb, vmem_limit)


def _reference(x, weight, bias, eps=EPS):
    x32 = x.astype(jnp.float32)
    mean = jnp.mean(x32, axis=(1, 2), keepdims=True)
    n = x.shape[1] * x.shape[2]
    var = jnp.sum((x32 - mean) ** 2, axis=(1, 2), keepdims=True) / (n - 1)
    std = jnp.sqrt(var + eps)
    return ((x32 - mean) / std * weight.reshape(-1, 1) + bias.reshape(-1, 1)).astype(x.dtype)


if __name__ == "__main__":
    key = jax.random.PRNGKey(0)
    k1, k2, k3, k4, k5 = jax.random.split(key, 5)

    # 1) Fused path, module defaults (weight=1, bias=0), lane-aligned T.
    x1 = jax.random.normal(k1, (2, 8, 128), dtype=jnp.float32)
    w1 = jnp.ones((8, 1), dtype=jnp.float32)
    b1 = jnp.zeros((8, 1), dtype=jnp.float32)
    o1 = jax.block_until_ready(global_layer_norm(x1, w1, b1))
    assert o1.shape == x1.shape
    assert jnp.allclose(o1, _reference(x1, w1, b1), atol=1e-4, rtol=1e-4)

    # 2) Fused path with T not a multiple of 128 (no wrapper pad) + non-trivial affine.
    x2 = jax.random.normal(k2, (2, 8, 200), dtype=jnp.float32)
    w2 = 0.5 + jax.random.uniform(k3, (8, 1), dtype=jnp.float32)
    b2 = 0.1 * jax.random.normal(k4, (8, 1), dtype=jnp.float32)
    o2 = jax.block_until_ready(global_layer_norm(x2, w2, b2))
    assert o2.shape == x2.shape
    assert jnp.allclose(o2, _reference(x2, w2, b2), atol=1e-4, rtol=1e-4)

    # 3) Fused path with a partial last batch block (bb=2 over B=3, no B padding).
    x3 = jax.random.normal(k5, (3, 8, 128), dtype=jnp.float32)
    o3 = jax.block_until_ready(global_layer_norm(x3, w2, b2, max_block_bytes=8192))
    assert o3.shape == x3.shape
    assert jnp.allclose(o3, _reference(x3, w2, b2), atol=1e-4, rtol=1e-4)

    # 4) Forced T-tiled two-kernel path (large-sample fallback), T divisible by tile.
    x4 = jax.random.normal(k1, (2, 8, 384), dtype=jnp.float32)
    o4 = jax.block_until_ready(global_layer_norm(x4, w2, b2, max_block_bytes=4096))
    assert o4.shape == x4.shape
    assert jnp.allclose(o4, _reference(x4, w2, b2), atol=1e-4, rtol=1e-4)

    # 5) Forced T-tiled path with a ragged tail (in-kernel mask, no padding pass).
    x5 = jax.random.normal(k2, (2, 8, 400), dtype=jnp.float32)
    o5 = jax.block_until_ready(global_layer_norm(x5, w2, b2, max_block_bytes=4096))
    assert o5.shape == x5.shape
    assert jnp.allclose(o5, _reference(x5, w2, b2), atol=1e-4, rtol=1e-4)

    print("KERNEL_OK")
</pallas_src>

<mosaic_0001>
module attributes {stable_mosaic.version = 11 : i64} {
  func.func @_gln_fused_kernel(%arg0: i32, %arg1: memref<1x8x128xf32, #tpu.memory_space<vmem>>, %arg2: memref<8x1xf32, #tpu.memory_space<vmem>>, %arg3: memref<8x1xf32, #tpu.memory_space<vmem>>, %arg4: memref<1x8x128xf32, #tpu.memory_space<vmem>>) attributes {dimension_semantics = [#tpu.dimension_semantics<parallel>], iteration_bounds = array<i64: 2>, scalar_prefetch = 0 : i64, scratch_operands = 0 : i64, tpu.core_type = #tpu.core_type<tc>, window_params = [{transform_indices = @transform_0, window_bounds = array<i64: 1, 8, 128>}, {pipeline_mode = #tpu.pipeline_mode<synchronous>, transform_indices = @transform_1, window_bounds = array<i64: 8, 1>}, {pipeline_mode = #tpu.pipeline_mode<synchronous>, transform_indices = @transform_2, window_bounds = array<i64: 8, 1>}, {transform_indices = @transform_3, window_bounds = array<i64: 1, 8, 128>}]} {
    %c0 = arith.constant 0 : index
    %c0_0 = arith.constant 0 : index
    %c0_1 = arith.constant 0 : index
    %0 = vector.load %arg1[%c0, %c0_0, %c0_1] : memref<1x8x128xf32, #tpu.memory_space<vmem>>, vector<1x8x128xf32>
    %cst = arith.constant dense<0.000000e+00> : vector<1x8xf32>
    %1 = vector.multi_reduction <add>, %0, %cst [2] : vector<1x8x128xf32> to vector<1x8xf32>
    %2 = vector.shape_cast %1 : vector<1x8xf32> to vector<1x8x1xf32>
    %3 = arith.mulf %0, %0 : vector<1x8x128xf32>
    %cst_2 = arith.constant dense<0.000000e+00> : vector<1x8xf32>
    %4 = vector.multi_reduction <add>, %3, %cst_2 [2] : vector<1x8x128xf32> to vector<1x8xf32>
    %5 = vector.shape_cast %4 : vector<1x8xf32> to vector<1x8x1xf32>
    %cst_3 = arith.constant dense<0.000000e+00> : vector<1x1xf32>
    %6 = vector.multi_reduction <add>, %2, %cst_3 [1] : vector<1x8x1xf32> to vector<1x1xf32>
    %7 = vector.shape_cast %6 : vector<1x1xf32> to vector<1x1x1xf32>
    %cst_4 = arith.constant dense<0.000000e+00> : vector<1x1xf32>
    %8 = vector.multi_reduction <add>, %5, %cst_4 [1] : vector<1x8x1xf32> to vector<1x1xf32>
    %9 = vector.shape_cast %8 : vector<1x1xf32> to vector<1x1x1xf32>
    %cst_5 = arith.constant 9.765625E-4 : f32
    %10 = vector.broadcast %cst_5 : f32 to vector<1x1x1xf32>
    %11 = arith.mulf %7, %10 : vector<1x1x1xf32>
    %12 = arith.mulf %7, %11 : vector<1x1x1xf32>
    %13 = arith.subf %9, %12 : vector<1x1x1xf32>
    %cst_6 = arith.constant 9.77517105E-4 : f32
    %14 = vector.broadcast %cst_6 : f32 to vector<1x1x1xf32>
    %15 = arith.mulf %13, %14 : vector<1x1x1xf32>
    %cst_7 = arith.constant 0.000000e+00 : f32
    %16 = vector.broadcast %cst_7 : f32 to vector<1x1x1xf32>
    %17 = arith.maximumf %15, %16 : vector<1x1x1xf32>
    %cst_8 = arith.constant 9.99999974E-6 : f32
    %18 = vector.broadcast %cst_8 : f32 to vector<1x1x1xf32>
    %19 = arith.addf %17, %18 : vector<1x1x1xf32>
    %20 = math.rsqrt %19 : vector<1x1x1xf32>
    %c0_9 = arith.constant 0 : index
    %c0_10 = arith.constant 0 : index
    %21 = vector.load %arg2[%c0_9, %c0_10] : memref<8x1xf32, #tpu.memory_space<vmem>>, vector<8x1xf32>
    %c0_11 = arith.constant 0 : index
    %c0_12 = arith.constant 0 : index
    %22 = vector.load %arg3[%c0_11, %c0_12] : memref<8x1xf32, #tpu.memory_space<vmem>>, vector<8x1xf32>
    %23 = vector.shape_cast %21 : vector<8x1xf32> to vector<1x8x1xf32>
    %24 = vector.broadcast %20 : vector<1x1x1xf32> to vector<1x8x1xf32>
    %25 = arith.mulf %24, %23 : vector<1x8x1xf32>
    %26 = vector.broadcast %11 : vector<1x1x1xf32> to vector<1x8x1xf32>
    %27 = arith.mulf %26, %25 : vector<1x8x1xf32>
    %28 = vector.shape_cast %22 : vector<8x1xf32> to vector<1x8x1xf32>
    %29 = arith.subf %28, %27 : vector<1x8x1xf32>
    %c0_13 = arith.constant 0 : index
    %c0_14 = arith.constant 0 : index
    %c0_15 = arith.constant 0 : index
    %30 = vector.load %arg1[%c0_13, %c0_14, %c0_15] : memref<1x8x128xf32, #tpu.memory_space<vmem>>, vector<1x8x128xf32>
    %31 = vector.broadcast %25 : vector<1x8x1xf32> to vector<1x8x128xf32>
    %32 = arith.mulf %30, %31 : vector<1x8x128xf32>
    %33 = vector.broadcast %29 : vector<1x8x1xf32> to vector<1x8x128xf32>
    %34 = arith.addf %32, %33 : vector<1x8x128xf32>
    %c0_16 = arith.constant 0 : index
    %c0_17 = arith.constant 0 : index
    %c0_18 = arith.constant 0 : index
    %35 = vector.load %arg4[%c0_16, %c0_17, %c0_18] : memref<1x8x128xf32, #tpu.memory_space<vmem>>, vector<1x8x128xf32>
    tpu.vector_store %arg4[%c0_16, %c0_17, %c0_18], %34 {strides = array<i32>} : memref<1x8x128xf32, #tpu.memory_space<vmem>>, vector<1x8x128xf32>,
    return
  }
  func.func @transform_0(%arg0: i32) -> (i32, i32, i32) {
    %c0_i32 = arith.constant 0 : i32
    %c0_i32_0 = arith.constant 0 : i32
    %c0_i32_1 = arith.constant 0 : i32
    return %arg0, %c0_i32, %c0_i32_0 : i32, i32, i32
  }
  func.func @transform_1(%arg0: i32) -> (i32, i32) {
    %c0_i32 = arith.constant 0 : i32
    %c0_i32_0 = arith.constant 0 : i32
    %c0_i32_1 = arith.constant 0 : i32
    return %c0_i32, %c0_i32_0 : i32, i32
  }
  func.func @transform_2(%arg0: i32) -> (i32, i32) {
    %c0_i32 = arith.constant 0 : i32
    %c0_i32_0 = arith.constant 0 : i32
    %c0_i32_1 = arith.constant 0 : i32
    return %c0_i32, %c0_i32_0 : i32, i32
  }
  func.func @transform_3(%arg0: i32) -> (i32, i32, i32) {
    %c0_i32 = arith.constant 0 : i32
    %c0_i32_0 = arith.constant 0 : i32
    %c0_i32_1 = arith.constant 0 : i32
    return %arg0, %c0_i32, %c0_i32_0 : i32, i32, i32
  }
}

</mosaic_0001>

<bundles_post_ra>
// kernel: tpu_custom_call.1
= control target key start
LH: loop header
LB: loop body
LE: loop exit
PB: predicated region body
PF: predicated region fallthrough
CT: control target
= control target key end

     0   :  { %8 = vsyncpa [#allocation3], 0  ;;  %s528_s0 = inlined_call_operand.vmem [shape: f32[2,8,128], index: 0, kind: input, shape index: {}]   ;;  %s529_s1 = inlined_call_operand.vmem [shape: f32[8,1], index: 1, kind: input, shape index: {}]   ;;  %s530_s2 = inlined_call_operand.vmem [shape: f32[8,1], index: 2, kind: input, shape index: {}]   ;;  %s531_s3 = inlined_call_operand.hbm [shape: f32[2,8,128], index: 3, kind: output, shape index: {}]  }
   0x1   :  { %10 = vsyncpa [#allocation3 + $0x1], 0  ;;  %s422_s12 = smov 0   ;;  %s424_s13 = smov 0  }
   0x2   :  { %s426_s14 = smov 0   ;;  %s428_s15 = smov 0  }
   0x3 LB: > { %s443_s16 = sadd.s32 4294967295, %s398_s15   ;;  %s282_s17 = sadd.s32 4294967294, %s398_s15   ;;  %s398_s15 = sphi %s428_s15, %s537_s15   ;;  %s394_s14 = sphi %s426_s14, %s536_s14   ;;  %s390_s13 = sphi %s424_s13, %s535_s13   ;;  %s386_s12 = sphi %s422_s12, %s534_s12  }
   0x4   : > { %s447_s18 = sadd.s32 1, %s398_s15   ;;  %s91_s19 = sadd.s32 1, %s394_s14 }
   0x5   : > { %s88_s20 = ssub.s32 %s398_s15, %s447_s18  ;;  %p101_p0 = scmp.ne.s32.totalorder %s394_s14, %s390_s13 }
   0x6   : > { %p89_p1 = scmp.eq.s32.totalorder %s88_s20, 0  ;;  %p102_p2 = scmp.eq.s32.totalorder %s443_s16, 1 }
   0x7   : > { %p107_p3 = scmp.ne.s32.totalorder %s390_s13, %s386_s12  ;;  %p108_p4 = scmp.eq.s32.totalorder %s282_s17, 1 }
   0x8   : > { %s458_s21 = scalar_select %p89_p1, %s394_s14, %s91_s19  }
   0x9   : > { %p460_p5 = por %p102_p2, %p101_p0  ;;  %p464_p6 = por %p108_p4, %p107_p3 }
   0xa   : > { %p285_p7 = scmp.ge.s32.totalorder %s398_s15, 1  ;;  %p139_p8 = scmp.lt.s32.totalorder %s398_s15, 3 }
   0xc   : > { %p140_p9 = pnand %p285_p7, %p139_p8 }
   0xd   : > { %p162_p10 = scmp.lt.s32.totalorder (!%p140_p9), %s443_s16, 1  ;;  %v400_v2 = vmov (!%p140_p9), 0   ;;  %v191_v23 = vld [vmem:[%s529_s1] sm:$0xff] (!%p140_p9)  ;;  %s159_s6 = sand.u32 (!%p140_p9), 1, %s390_s13  }
   0xe   : > { %143 = sbr.rel (%p140_p9) target bundleno = 353 (0x161), region = 32  ;;  %332 = vset.pattern.permute.xlu1 (!%p140_p9), %v400_v2  ;;  %333 = vset.pattern.permute.xlu0 (!%p140_p9), %v400_v2  ;;  %v192_v26 = vld [vmem:[%s530_s2] sm:$0xff] (!%p140_p9)  ;;  %s286_s7 = sshll.u32 (!%p140_p9), %s159_s6, 3 }
   0xf   : > { %s289_s8 = sshll.u32 (!%p140_p9), %s443_s16, 7  ;;  %s161_s9 = scalar_lea.vmem (!%p140_p9), [#allocation2], %s286_s7 }
  0x10   : > { %s223_s10 = sshll.u32 (!%p140_p9), %s161_s9, 4  ;;  %s486_s19 = scalar_lea.hbm (!%p140_p9), %s531_s3, %s289_s8  ;;  %s488_s10 = int_to_ptr.vmem [resolvable:$true] %s223_s10 }
  0x11   : > { %s210_s20 = scalar_lea.sflag (!%p140_p9), [#allocation3], %s159_s6 }
  0x15   : > { %s163_s24 = scalar_select %p162_p10, %s443_s16, 1 }
  0x16   : > { %s401_s16 = smov [#allocation2]  }
  0x17   : > { %s287_s25 = sshll.u32 %s163_s24, 3  ;;  %s336_s24 = scalar_lea.vmem %s488_s10, 128 }
  0x18   : > { %s165_s28 = scalar_lea.vmem %s528_s0, %s287_s25  ;;  %p337_p11 = scmp.ne.s32.totalorder %s488_s10, %s336_s24 }
  0x19   : > { %v166_v0 = vld [vmem:[%s165_s28] sm:$0xff]  ;;  %s340_s25 = sshll.u32 %s401_s16, 4  ;;  %s341_s25 = int_to_ptr.vmem [resolvable:$false] %s340_s25 }
  0x1a   : > { %167 = vadd.xlane.f32.xlu0 %v166_v0  ;;  %v169_v1 = vmul.f32 %v166_v0, %v166_v0  ;;  %p338_p12 = pnand %p337_p11, %p460_p5  ;;  %s342_s26 = scalar_lea.vmem %s341_s25, 256 }
  0x1b   : > { %p343_p0 = scmp.lt.s32.totalorder %s488_s10, %s341_s25  ;;  %p344_p1 = scmp.lt.s32.totalorder %s342_s26, %s336_s24 }
  0x1c   : > { %p339_p13 = pneg %p338_p12 }
  0x1d   : > { %p345_p2 = por %p344_p1, %p343_p0 }
  0x1e   : > { %170 = vadd.xlane.f32.xlu0 %v169_v1 }
  0x1f   : > { %p346_p3 = pnand %p345_p2, %p339_p13 }
  0xa7   : > { %v168_v3 = vpop.xlane.xlu0 %167 }
  0xa8   : > { %v172_v4 = vrot.slane %v168_v3, 4 }
  0xaa   : > { %v173_v5 = vadd.f32 %v172_v4, %v168_v3 }
  0xab   : > { %v171_v6 = vpop.xlane.xlu0 %170 }
  0xac   : > { %v174_v7 = vrot.slane %v173_v5, 2  ;;  %v178_v8 = vrot.slane %v171_v6, 4 }
  0xae   : > { %v175_v9 = vadd.f32 %v174_v7, %v173_v5  ;;  %v179_v10 = vadd.f32 %v178_v8, %v171_v6 }
  0xb0   : > { %v176_v11 = vrot.slane %v175_v9, 1  ;;  %v180_v12 = vrot.slane %v179_v10, 2 }
  0xb2   : > { %v177_v13 = vadd.f32 %v176_v11, %v175_v9  ;;  %v181_v14 = vadd.f32 %v180_v12, %v179_v10 }
  0xb4   : > { %v182_v15 = vrot.slane %v181_v14, 1  ;;  %v184_v16 = vmul.f32 0.0009765625, %v177_v13 }
  0xb6   : > { %v183_v17 = vadd.f32 %v182_v15, %v181_v14  ;;  %v185_v18 = vmul.f32 %v184_v16, %v177_v13 }
  0xb8   : > { %v186_v19 = vsub.f32 %v183_v17, %v185_v18 }
  0xba   : > { %v187_v20 = vmul.f32 0.0009775171, %v186_v19 }
  0xbc   : > { %v188_v21 = vmax.f32 %v187_v20, 0.0 }
  0xbe   : > { %v189_v22 = vadd.f32 1e-05, %v188_v21 }
  0xc0   : > { %334 = vrsqrt.f32 %v189_v22 }
  0xca   : > { %v335_v24 = vpop.eup %334 }
  0xcb   : > { %v193_v25 = vmul.f32 %v335_v24, %v191_v23 }
  0xcd   : > { %198 = vperm.xlu1 %332, %v193_v25   ;;  %v194_v27 = vmul.f32 %v193_v25, %v184_v16 }
  0xcf   : > { %v195_v28 = vsub.f32 %v192_v26, %v194_v27 }
  0xd1   : > { %204 = vperm.xlu1 %332, %v195_v28  }
 0x14c   : > { %v199_v29 = vpop.permute.xlu1 %198 }
 0x14d   : > { %v201_v30 = vmul.f32 %v199_v29, %v166_v0 }
 0x150   : > { %v205_v31 = vpop.permute.xlu1 %204 }
 0x151   : > { %v207_v32 = vadd.f32 %v205_v31, %v201_v30 }
 0x153   : > { %208 = vst [vmem:[%s161_s9] sm:$0xff] %v207_v32 }
 0x154   : > { %349 = shalt.err (!%p346_p3)
}
 0x155   : > { %s350_s27 = scalar_lea.hbm %s486_s19, 128  ;;  %s354_s30 = scalar_lea.hbm %s531_s3, 256 }
 0x156   : > { %p351_p4 = scmp.ne.s32.totalorder %s486_s19, %s350_s27  ;;  %p355_p9 = scmp.lt.u32.totalorder %s486_s19, %s531_s3 }
 0x157   : > { %p356_p10 = scmp.lt.u32.totalorder %s354_s30, %s350_s27  ;;  %p358_p12 = scmp.lt.u32.totalorder %s350_s27, %s486_s19 }
 0x158   : > { %p352_p7 = pnand %p351_p4, %p460_p5 }
 0x159   : > { %p357_p11 = por %p356_p10, %p355_p9 }
 0x15a   : > { %p353_p8 = pneg %p352_p7 }
 0x15b   : > { %p359_p13 = por %p358_p12, %p357_p11 }
 0x15d   : > { %p360_p0 = pnand %p359_p13, %p353_p8 }
 0x15f   : > { %363 = shalt.err (!%p360_p0)
}
 0x160   : > { %292 = dma.vmem_to_hbm [thread:$0]  (%p460_p5), %s488_s10, 128, %s486_s19, %s210_s20  }
 0x161 PF: > { %p298_p1 = scmp.ge.s32.totalorder %s398_s15, 2  ;;  %s235_s6 = sand.u32 1, %s386_s12  }
 0x162   : > { %s236_s7 = scalar_lea.sflag [#allocation3], %s235_s6 }
 0x163   : > { %p295_p2 = pnand %p298_p1, %p464_p6 }
 0x165   : > { %381 = dma.done.wait (!%p295_p2), %s236_s7, 128  }
 0x166   : > { %383 = vsyncadd (!%p295_p2), %s236_s7, 4294967168  ;;  %p13_p3 = scmp.ge.s32.totalorder %s447_s18, 4   ;;  %s534_s12 = smov %s390_s13 }
 0x167   : > { %s535_s13 = smov %s394_s14  ;;  %s536_s14 = smov %s458_s21 }
 0x168   : > { %s537_s15 = smov %s447_s18  ;;  %15 = sbr.rel (!%p13_p3) target bundleno = 3 (0x3), region = 67 }
 0x16f   :  { %241 = vsyncpa [#allocation3], 1 }
 0x170   :  { %243 = vsyncpa [#allocation3 + $0x1], 1 }

</bundles_post_ra>
